<compile_context>
chip_gen: v5e
topology: v5e:2x2
jax: 0.10.0
libtpu: 0.0.40
codegen_flags: <defaults>
</compile_context>

<pallas_src>
import jax
import jax.numpy as jnp
from jax.experimental import pallas as pl
from jax.experimental.pallas import tpu as pltpu

LN_EPS = 1e-5

_BUFFERED_CONST_OK = True  # flips to False if pl.Buffered(1) is rejected


def _round_up(x, m):
    return ((x + m - 1) // m) * m


def _vmem_cap_bytes():
    # Stay well below physical VMEM (64 MiB/TC on v7x) so Mosaic keeps headroom
    # for internal scratch / semaphores / pipeline bookkeeping.
    try:
        return int(pltpu.get_tpu_info().vmem_capacity_bytes * 3 // 4)
    except Exception:
        return 48 << 20


def policy_kernel(obs_ref,
                  w1_ref, b1_ref, g_ref, be_ref,        # trunk: Linear + LayerNorm
                  w2_ref, b2_ref,                       # policy layer 1
                  w3_ref, b3_ref,                       # policy layer 2
                  w4_ref, b4_ref,                       # fused head [w_mu | w_ls]
                  out_ref,                              # (TB, 2*out_pad) = [mu | std]
                  acc_ref):                             # (TB, feature_dim) f32 scratch
    k = pl.program_id(1)

    # ---- trunk matmul, accumulated over the repr_dim (K) grid axis ----
    @pl.when(k == 0)
    def _():
        acc_ref[...] = jnp.zeros_like(acc_ref)

    acc_ref[...] += jnp.dot(obs_ref[...], w1_ref[...],
                            preferred_element_type=jnp.float32)

    # ---- finalize: LayerNorm + Tanh + policy MLP + gaussian head params ----
    @pl.when(k == pl.num_programs(1) - 1)
    def _():
        h = acc_ref[...] + b1_ref[...]
        mean = jnp.mean(h, axis=-1, keepdims=True)
        var = jnp.mean((h - mean) ** 2, axis=-1, keepdims=True)
        h = (h - mean) * jax.lax.rsqrt(var + LN_EPS)
        h = jnp.tanh(h * g_ref[...] + be_ref[...])

        a = jnp.dot(h.astype(w2_ref.dtype), w2_ref[...],
                    preferred_element_type=jnp.float32) + b2_ref[...]
        a = jnp.maximum(a, 0.0)
        a = jnp.dot(a.astype(w3_ref.dtype), w3_ref[...],
                    preferred_element_type=jnp.float32) + b3_ref[...]
        a = jnp.maximum(a, 0.0)

        # Single fused head matmul (N = 2*out_pad fills the 256-wide MXU).
        head = jnp.dot(a.astype(w4_ref.dtype), w4_ref[...],
                       preferred_element_type=jnp.float32) + b4_ref[...]
        out_pad = head.shape[-1] // 2            # static, 128-aligned split
        mu = head[:, :out_pad]
        log_scale = jnp.clip(head[:, out_pad:], -20.0, 2.0)
        out_ref[...] = jnp.concatenate(
            [mu, jnp.exp(log_scale)], axis=-1).astype(out_ref.dtype)
        # TODO(synk): the TanhTransform / Normal distribution object has no tensor
        # equivalent; downstream sampling would do tanh(mu + std * eps).


def prepare_params(params, *, tk=4096):
    """One-time pad / bf16-cast of the weights (hoisted out of the hot path)."""
    bf16 = jnp.bfloat16
    repr_dim, feature_dim = params["w1"].shape
    hidden_dim = params["w2"].shape[1]
    act_dim = params["w4"].shape[1] // 2
    out_pad = _round_up(act_dim, 128)            # lane-dense head output width

    # K (repr_dim) tiling: split into nk near-equal 128-aligned chunks of <= ~tk,
    # so the obs/w1 zero padding stays tiny (< 128*nk elements of K).
    k128 = _round_up(repr_dim, 128)
    nk = pl.cdiv(k128, tk)
    TK = 128 * pl.cdiv(k128 // 128, nk)
    K_pad = nk * TK

    w1 = jnp.pad(params["w1"], ((0, K_pad - repr_dim), (0, 0))).astype(bf16)
    w4, b4 = params["w4"], params["b4"]
    pad_cols = ((0, 0), (0, out_pad - act_dim))
    w4f = jnp.concatenate([jnp.pad(w4[:, :act_dim], pad_cols),
                           jnp.pad(w4[:, act_dim:], pad_cols)], axis=1).astype(bf16)
    b4f = jnp.concatenate([jnp.pad(b4[:, :act_dim], pad_cols),
                           jnp.pad(b4[:, act_dim:], pad_cols)], axis=1)

    return dict(
        w1=w1, b1=params["b1"], ln_g=params["ln_g"], ln_b=params["ln_b"],
        w2=params["w2"].astype(bf16), b2=params["b2"],
        w3=params["w3"].astype(bf16), b3=params["b3"],
        w4=w4f, b4=b4f,
        repr_dim=repr_dim, feature_dim=feature_dim, hidden_dim=hidden_dim,
        act_dim=act_dim, out_pad=out_pad, TK=TK, K_pad=K_pad, nk=nk,
    )


def policy_forward(obs, prep, *, tb=256):
    B, repr_dim = obs.shape
    assert repr_dim == prep["repr_dim"]
    feature_dim, hidden_dim = prep["feature_dim"], prep["hidden_dim"]
    act_dim, out_pad = prep["act_dim"], prep["out_pad"]
    TK, K_pad, nk = prep["TK"], prep["K_pad"], prep["nk"]
    out2 = 2 * out_pad

    # ---- batch tiling: keep >= 2 batch blocks whenever B allows it, so the
    # "parallel" axis can be megacore-sharded across both v7x TensorCores ----
    TB = min(tb, _round_up(B, 8))
    if _round_up(B, TB) // TB == 1 and TB > 8:
        TB = _round_up((TB + 1) // 2, 8)
    B_pad = _round_up(B, TB)

    # Padded batch rows flow through LayerNorm/tanh harmlessly (all-equal rows,
    # finite outputs) and are sliced away below -- do not remove the slice.
    # TODO(synk): for act()-style B~1 inference, keep weights VMEM-resident via
    # a cross-pallas_call prefetch (P10) and fuse this pad/cast into the input
    # stream (allow_input_fusion) instead of materializing obs_p.
    obs_p = jnp.pad(obs, ((0, B_pad - B), (0, K_pad - repr_dim))).astype(jnp.bfloat16)

    grid = (B_pad // TB, nk)                     # (parallel batch, arbitrary K)

    # ---- VMEM budget (upper bound: double-buffered everything + accumulator),
    # capped well below physical VMEM ----
    est = (2 * TB * TK * 2
           + 2 * TK * feature_dim * 2
           + 2 * (feature_dim * hidden_dim + hidden_dim * hidden_dim
                  + hidden_dim * out2) * 2
           + 2 * (3 * feature_dim + 2 * hidden_dim + out2) * 4
           + 2 * TB * out2 * 4
           + TB * feature_dim * 4)
    vmem_limit = int(min(max(3 * est, 32 << 20), _vmem_cap_bytes()))

    cost = pl.CostEstimate(
        flops=2 * B_pad * (K_pad * feature_dim + feature_dim * hidden_dim
                           + hidden_dim * hidden_dim + hidden_dim * out2),
        transcendentals=B_pad * (feature_dim + out_pad),
        bytes_accessed=(obs_p.size * 2
                        + (prep["w1"].size + prep["w2"].size + prep["w3"].size
                           + prep["w4"].size) * 2
                        + B_pad * out2 * 4),
    )

    def run(buffered_const):
        if buffered_const:
            # Constant blocks never change across grid steps -> single buffer
            # instead of a dead double buffer (reclaims VMEM, esp. on v7x).
            const = lambda shape: pl.BlockSpec(shape, lambda i, k: (0, 0),
                                               pipeline_mode=pl.Buffered(1))
        else:
            const = lambda shape: pl.BlockSpec(shape, lambda i, k: (0, 0))
        in_specs = [
            pl.BlockSpec((TB, TK), lambda i, k: (i, k)),            # obs
            pl.BlockSpec((TK, feature_dim), lambda i, k: (k, 0)),   # w1
            const((1, feature_dim)),                                # b1
            const((1, feature_dim)),                                # ln gamma
            const((1, feature_dim)),                                # ln beta
            const((feature_dim, hidden_dim)),                       # w2
            const((1, hidden_dim)),                                 # b2
            const((hidden_dim, hidden_dim)),                        # w3
            const((1, hidden_dim)),                                 # b3
            const((hidden_dim, out2)),                              # w4 = [w_mu | w_ls]
            const((1, out2)),                                       # b4 = [b_mu | b_ls]
        ]
        out_specs = pl.BlockSpec((TB, out2), lambda i, k: (i, 0))
        return pl.pallas_call(
            policy_kernel,
            out_shape=jax.ShapeDtypeStruct((B_pad, out2), jnp.float32),
            grid=grid,
            in_specs=in_specs,
            out_specs=out_specs,
            scratch_shapes=[pltpu.VMEM((TB, feature_dim), jnp.float32)],
            compiler_params=pltpu.CompilerParams(
                dimension_semantics=("parallel", "arbitrary"),
                vmem_limit_bytes=vmem_limit),
            cost_estimate=cost,
        )(obs_p, prep["w1"], prep["b1"], prep["ln_g"], prep["ln_b"],
          prep["w2"], prep["b2"], prep["w3"], prep["b3"],
          prep["w4"], prep["b4"])

    global _BUFFERED_CONST_OK
    if _BUFFERED_CONST_OK:
        try:
            out = run(True)
        except Exception:
            # This jax build rejects pipeline_mode=pl.Buffered(1); fall back to
            # default double-buffering of the constant blocks.
            _BUFFERED_CONST_OK = False
            out = run(False)
    else:
        out = run(False)

    mu = out[:B, :act_dim]
    std = out[:B, out_pad:out_pad + act_dim]
    return mu, std


def make_params(key, repr_dim, feature_dim, hidden_dim, action_dim):
    ks = jax.random.split(key, 8)

    def lin(kw, fan_in, fan_out):
        scale = 1.0 / jnp.sqrt(fan_in)
        w = jax.random.uniform(kw, (fan_in, fan_out), jnp.float32, -scale, scale)
        b = jnp.zeros((1, fan_out), jnp.float32)
        return w, b

    w1, b1 = lin(ks[0], repr_dim, feature_dim)
    w2, b2 = lin(ks[1], feature_dim, hidden_dim)
    w3, b3 = lin(ks[2], hidden_dim, hidden_dim)
    w4, b4 = lin(ks[3], hidden_dim, 2 * action_dim)
    return dict(
        w1=w1, b1=b1,
        ln_g=jnp.ones((1, feature_dim), jnp.float32),
        ln_b=jnp.zeros((1, feature_dim), jnp.float32),
        w2=w2, b2=b2, w3=w3, b3=b3, w4=w4, b4=b4,
    )


def reference_forward(obs, p, mirror_bf16=True):
    """Pure-JAX reference. With mirror_bf16=True it applies the same bf16
    quantization to matmul operands as the kernel (f32 accumulation)."""
    def q(x):
        return x.astype(jnp.bfloat16).astype(jnp.float32) if mirror_bf16 else x

    h = jnp.dot(q(obs), q(p["w1"])) + p["b1"]
    mean = h.mean(-1, keepdims=True)
    var = ((h - mean) ** 2).mean(-1, keepdims=True)
    h = jnp.tanh((h - mean) / jnp.sqrt(var + LN_EPS) * p["ln_g"] + p["ln_b"])
    a = jnp.maximum(jnp.dot(q(h), q(p["w2"])) + p["b2"], 0.0)
    a = jnp.maximum(jnp.dot(q(a), q(p["w3"])) + p["b3"], 0.0)
    mustd = jnp.dot(q(a), q(p["w4"])) + p["b4"]
    act_dim = mustd.shape[-1] // 2
    mu, log_scale = mustd[:, :act_dim], mustd[:, act_dim:]
    return mu, jnp.exp(jnp.clip(log_scale, -20.0, 2.0))


if __name__ == "__main__":
    repr_dim, feature_dim, hidden_dim, action_dim, batch = 64, 32, 32, 4, 8

    key = jax.random.PRNGKey(0)
    k_obs, k_par = jax.random.split(key)
    obs = jax.random.normal(k_obs, (batch, repr_dim), jnp.float32)
    params = make_params(k_par, repr_dim, feature_dim, hidden_dim, action_dim)

    prep = prepare_params(params)            # one-time weight pad/cast
    mu, std = policy_forward(obs, prep)
    jax.block_until_ready((mu, std))

    mu_ref, std_ref = reference_forward(obs, params, mirror_bf16=True)
    assert mu.shape == (batch, action_dim) and std.shape == (batch, action_dim)
    assert jnp.allclose(mu, mu_ref, atol=2e-2, rtol=2e-2)
    assert jnp.allclose(std, std_ref, atol=2e-2, rtol=2e-2)

    print("KERNEL_OK")
</pallas_src>

<mosaic_0001>
module attributes {stable_mosaic.version = 11 : i64} {
  func.func @policy_kernel(%arg0: i32, %arg1: i32, %arg2: memref<8x128xbf16, #tpu.memory_space<vmem>>, %arg3: memref<128x32xbf16, #tpu.memory_space<vmem>>, %arg4: memref<1x32xf32, #tpu.memory_space<vmem>>, %arg5: memref<1x32xf32, #tpu.memory_space<vmem>>, %arg6: memref<1x32xf32, #tpu.memory_space<vmem>>, %arg7: memref<32x32xbf16, #tpu.memory_space<vmem>>, %arg8: memref<1x32xf32, #tpu.memory_space<vmem>>, %arg9: memref<32x32xbf16, #tpu.memory_space<vmem>>, %arg10: memref<1x32xf32, #tpu.memory_space<vmem>>, %arg11: memref<32x256xbf16, #tpu.memory_space<vmem>>, %arg12: memref<1x256xf32, #tpu.memory_space<vmem>>, %arg13: memref<8x256xf32, #tpu.memory_space<vmem>>, %arg14: memref<8x32xf32, #tpu.memory_space<vmem>>) attributes {dimension_semantics = [#tpu.dimension_semantics<parallel>, #tpu.dimension_semantics<arbitrary>], iteration_bounds = array<i64: 1, 1>, scalar_prefetch = 0 : i64, scratch_operands = 1 : i64, tpu.core_type = #tpu.core_type<tc>, window_params = [{transform_indices = @transform_0, window_bounds = array<i64: 8, 128>}, {transform_indices = @transform_1, window_bounds = array<i64: 128, 32>}, {pipeline_mode = #tpu.pipeline_mode<synchronous>, transform_indices = @transform_2, window_bounds = array<i64: 1, 32>}, {pipeline_mode = #tpu.pipeline_mode<synchronous>, transform_indices = @transform_3, window_bounds = array<i64: 1, 32>}, {pipeline_mode = #tpu.pipeline_mode<synchronous>, transform_indices = @transform_4, window_bounds = array<i64: 1, 32>}, {pipeline_mode = #tpu.pipeline_mode<synchronous>, transform_indices = @transform_5, window_bounds = array<i64: 32, 32>}, {pipeline_mode = #tpu.pipeline_mode<synchronous>, transform_indices = @transform_6, window_bounds = array<i64: 1, 32>}, {pipeline_mode = #tpu.pipeline_mode<synchronous>, transform_indices = @transform_7, window_bounds = array<i64: 32, 32>}, {pipeline_mode = #tpu.pipeline_mode<synchronous>, transform_indices = @transform_8, window_bounds = array<i64: 1, 32>}, {pipeline_mode = #tpu.pipeline_mode<synchronous>, transform_indices = @transform_9, window_bounds = array<i64: 32, 256>}, {pipeline_mode = #tpu.pipeline_mode<synchronous>, transform_indices = @transform_10, window_bounds = array<i64: 1, 256>}, {transform_indices = @transform_11, window_bounds = array<i64: 8, 256>}]} {
    %c0_i32 = arith.constant 0 : i32
    %0 = arith.cmpi eq, %arg1, %c0_i32 : i32
    %1 = arith.extui %0 : i1 to i32
    %c0_i32_0 = arith.constant 0 : i32
    %2 = arith.cmpi ne, %1, %c0_i32_0 : i32
    scf.if %2 {
      %cst_10 = arith.constant 0.000000e+00 : f32
      %12 = vector.broadcast %cst_10 : f32 to vector<8x32xf32>
      %c0_11 = arith.constant 0 : index
      %c0_12 = arith.constant 0 : index
      %13 = vector.load %arg14[%c0_11, %c0_12] : memref<8x32xf32, #tpu.memory_space<vmem>>, vector<8x32xf32>
      tpu.vector_store %arg14[%c0_11, %c0_12], %12 {strides = array<i32>} : memref<8x32xf32, #tpu.memory_space<vmem>>, vector<8x32xf32>,
    } else {
    }
    %c0 = arith.constant 0 : index
    %c0_1 = arith.constant 0 : index
    %3 = vector.load %arg14[%c0, %c0_1] : memref<8x32xf32, #tpu.memory_space<vmem>>, vector<8x32xf32>
    %c0_2 = arith.constant 0 : index
    %c0_3 = arith.constant 0 : index
    %4 = vector.load %arg2[%c0_2, %c0_3] : memref<8x128xbf16, #tpu.memory_space<vmem>>, vector<8x128xbf16>
    %c0_4 = arith.constant 0 : index
    %c0_5 = arith.constant 0 : index
    %5 = vector.load %arg3[%c0_4, %c0_5] : memref<128x32xbf16, #tpu.memory_space<vmem>>, vector<128x32xbf16>
    %cst = arith.constant dense<0.000000e+00> : vector<8x32xf32>
    %6 = tpu.matmul %4, %5, %cst {dimension_numbers = #tpu.dot_dimension_numbers<[1], [0], [0], [1], [0, 0, 1, 1], [], []>} : vector<8x128xbf16>, vector<128x32xbf16>, vector<8x32xf32> -> vector<8x32xf32>
    %7 = arith.addf %3, %6 : vector<8x32xf32>
    %c0_6 = arith.constant 0 : index
    %c0_7 = arith.constant 0 : index
    %8 = vector.load %arg14[%c0_6, %c0_7] : memref<8x32xf32, #tpu.memory_space<vmem>>, vector<8x32xf32>
    tpu.vector_store %arg14[%c0_6, %c0_7], %7 {strides = array<i32>} : memref<8x32xf32, #tpu.memory_space<vmem>>, vector<8x32xf32>,
    %c0_i32_8 = arith.constant 0 : i32
    %9 = arith.cmpi eq, %arg1, %c0_i32_8 : i32
    %10 = arith.extui %9 : i1 to i32
    %c0_i32_9 = arith.constant 0 : i32
    %11 = arith.cmpi ne, %10, %c0_i32_9 : i32
    scf.if %11 {
      %c0_10 = arith.constant 0 : index
      %c0_11 = arith.constant 0 : index
      %12 = vector.load %arg14[%c0_10, %c0_11] : memref<8x32xf32, #tpu.memory_space<vmem>>, vector<8x32xf32>
      %c0_12 = arith.constant 0 : index
      %c0_13 = arith.constant 0 : index
      %13 = vector.load %arg4[%c0_12, %c0_13] : memref<1x32xf32, #tpu.memory_space<vmem>>, vector<1x32xf32>
      %14 = vector.broadcast %13 : vector<1x32xf32> to vector<8x32xf32>
      %15 = arith.addf %12, %14 : vector<8x32xf32>
      %cst_14 = arith.constant dense<0.000000e+00> : vector<8xf32>
      %16 = vector.multi_reduction <add>, %15, %cst_14 [1] : vector<8x32xf32> to vector<8xf32>
      %17 = vector.shape_cast %16 : vector<8xf32> to vector<8x1xf32>
      %cst_15 = arith.constant 3.200000e+01 : f32
      %18 = vector.broadcast %cst_15 : f32 to vector<8x1xf32>
      %19 = arith.divf %17, %18 : vector<8x1xf32>
      %20 = vector.broadcast %19 : vector<8x1xf32> to vector<8x32xf32>
      %21 = arith.subf %15, %20 : vector<8x32xf32>
      %22 = arith.mulf %21, %21 : vector<8x32xf32>
      %cst_16 = arith.constant dense<0.000000e+00> : vector<8xf32>
      %23 = vector.multi_reduction <add>, %22, %cst_16 [1] : vector<8x32xf32> to vector<8xf32>
      %24 = vector.shape_cast %23 : vector<8xf32> to vector<8x1xf32>
      %cst_17 = arith.constant 3.200000e+01 : f32
      %25 = vector.broadcast %cst_17 : f32 to vector<8x1xf32>
      %26 = arith.divf %24, %25 : vector<8x1xf32>
      %27 = vector.broadcast %19 : vector<8x1xf32> to vector<8x32xf32>
      %28 = arith.subf %15, %27 : vector<8x32xf32>
      %cst_18 = arith.constant 9.99999974E-6 : f32
      %29 = vector.broadcast %cst_18 : f32 to vector<8x1xf32>
      %30 = arith.addf %26, %29 : vector<8x1xf32>
      %31 = math.rsqrt %30 : vector<8x1xf32>
      %32 = vector.broadcast %31 : vector<8x1xf32> to vector<8x32xf32>
      %33 = arith.mulf %28, %32 : vector<8x32xf32>
      %c0_19 = arith.constant 0 : index
      %c0_20 = arith.constant 0 : index
      %34 = vector.load %arg5[%c0_19, %c0_20] : memref<1x32xf32, #tpu.memory_space<vmem>>, vector<1x32xf32>
      %35 = vector.broadcast %34 : vector<1x32xf32> to vector<8x32xf32>
      %36 = arith.mulf %33, %35 : vector<8x32xf32>
      %c0_21 = arith.constant 0 : index
      %c0_22 = arith.constant 0 : index
      %37 = vector.load %arg6[%c0_21, %c0_22] : memref<1x32xf32, #tpu.memory_space<vmem>>, vector<1x32xf32>
      %38 = vector.broadcast %37 : vector<1x32xf32> to vector<8x32xf32>
      %39 = arith.addf %36, %38 : vector<8x32xf32>
      %40 = math.tanh %39 : vector<8x32xf32>
      %41 = arith.truncf %40 : vector<8x32xf32> to vector<8x32xbf16>
      %c0_23 = arith.constant 0 : index
      %c0_24 = arith.constant 0 : index
      %42 = vector.load %arg7[%c0_23, %c0_24] : memref<32x32xbf16, #tpu.memory_space<vmem>>, vector<32x32xbf16>
      %cst_25 = arith.constant dense<0.000000e+00> : vector<8x32xf32>
      %43 = tpu.matmul %41, %42, %cst_25 {dimension_numbers = #tpu.dot_dimension_numbers<[1], [0], [0], [1], [0, 0, 1, 1], [], []>} : vector<8x32xbf16>, vector<32x32xbf16>, vector<8x32xf32> -> vector<8x32xf32>
      %c0_26 = arith.constant 0 : index
      %c0_27 = arith.constant 0 : index
      %44 = vector.load %arg8[%c0_26, %c0_27] : memref<1x32xf32, #tpu.memory_space<vmem>>, vector<1x32xf32>
      %45 = vector.broadcast %44 : vector<1x32xf32> to vector<8x32xf32>
      %46 = arith.addf %43, %45 : vector<8x32xf32>
      %cst_28 = arith.constant 0.000000e+00 : f32
      %47 = vector.broadcast %cst_28 : f32 to vector<8x32xf32>
      %48 = arith.maximumf %46, %47 : vector<8x32xf32>
      %49 = arith.truncf %48 : vector<8x32xf32> to vector<8x32xbf16>
      %c0_29 = arith.constant 0 : index
      %c0_30 = arith.constant 0 : index
      %50 = vector.load %arg9[%c0_29, %c0_30] : memref<32x32xbf16, #tpu.memory_space<vmem>>, vector<32x32xbf16>
      %cst_31 = arith.constant dense<0.000000e+00> : vector<8x32xf32>
      %51 = tpu.matmul %49, %50, %cst_31 {dimension_numbers = #tpu.dot_dimension_numbers<[1], [0], [0], [1], [0, 0, 1, 1], [], []>} : vector<8x32xbf16>, vector<32x32xbf16>, vector<8x32xf32> -> vector<8x32xf32>
      %c0_32 = arith.constant 0 : index
      %c0_33 = arith.constant 0 : index
      %52 = vector.load %arg10[%c0_32, %c0_33] : memref<1x32xf32, #tpu.memory_space<vmem>>, vector<1x32xf32>
      %53 = vector.broadcast %52 : vector<1x32xf32> to vector<8x32xf32>
      %54 = arith.addf %51, %53 : vector<8x32xf32>
      %cst_34 = arith.constant 0.000000e+00 : f32
      %55 = vector.broadcast %cst_34 : f32 to vector<8x32xf32>
      %56 = arith.maximumf %54, %55 : vector<8x32xf32>
      %57 = arith.truncf %56 : vector<8x32xf32> to vector<8x32xbf16>
      %c0_35 = arith.constant 0 : index
      %c0_36 = arith.constant 0 : index
      %58 = vector.load %arg11[%c0_35, %c0_36] : memref<32x256xbf16, #tpu.memory_space<vmem>>, vector<32x256xbf16>
      %cst_37 = arith.constant dense<0.000000e+00> : vector<8x256xf32>
      %59 = tpu.matmul %57, %58, %cst_37 {dimension_numbers = #tpu.dot_dimension_numbers<[1], [0], [0], [1], [0, 0, 1, 1], [], []>} : vector<8x32xbf16>, vector<32x256xbf16>, vector<8x256xf32> -> vector<8x256xf32>
      %c0_38 = arith.constant 0 : index
      %c0_39 = arith.constant 0 : index
      %60 = vector.load %arg12[%c0_38, %c0_39] : memref<1x256xf32, #tpu.memory_space<vmem>>, vector<1x256xf32>
      %61 = vector.broadcast %60 : vector<1x256xf32> to vector<8x256xf32>
      %62 = arith.addf %59, %61 : vector<8x256xf32>
      %63 = vector.extract_strided_slice %62 {offsets = [0, 0], sizes = [8, 128], strides = [1, 1]} : vector<8x256xf32> to vector<8x128xf32>
      %64 = vector.extract_strided_slice %62 {offsets = [0, 128], sizes = [8, 128], strides = [1, 1]} : vector<8x256xf32> to vector<8x128xf32>
      %cst_40 = arith.constant -2.000000e+01 : f32
      %cst_41 = arith.constant 2.000000e+00 : f32
      %65 = vector.broadcast %cst_40 : f32 to vector<8x128xf32>
      %66 = arith.maximumf %65, %64 : vector<8x128xf32>
      %67 = vector.broadcast %cst_41 : f32 to vector<8x128xf32>
      %68 = arith.minimumf %67, %66 : vector<8x128xf32>
      %69 = math.exp %68 : vector<8x128xf32>
      %70 = tpu.concatenate %63, %69 in 1 : vector<8x128xf32>, vector<8x128xf32> -> vector<8x256xf32>
      %c0_42 = arith.constant 0 : index
      %c0_43 = arith.constant 0 : index
      %71 = vector.load %arg13[%c0_42, %c0_43] : memref<8x256xf32, #tpu.memory_space<vmem>>, vector<8x256xf32>
      tpu.vector_store %arg13[%c0_42, %c0_43], %70 {strides = array<i32>} : memref<8x256xf32, #tpu.memory_space<vmem>>, vector<8x256xf32>,
    } else {
    }
    return
  }
  func.func @transform_0(%arg0: i32, %arg1: i32) -> (i32, i32) {
    %c0_i32 = arith.constant 0 : i32
    return %arg0, %arg1 : i32, i32
  }
  func.func @transform_1(%arg0: i32, %arg1: i32) -> (i32, i32) {
    %c0_i32 = arith.constant 0 : i32
    %c0_i32_0 = arith.constant 0 : i32
    return %arg1, %c0_i32 : i32, i32
  }
  func.func @transform_2(%arg0: i32, %arg1: i32) -> (i32, i32) {
    %c0_i32 = arith.constant 0 : i32
    %c0_i32_0 = arith.constant 0 : i32
    %c0_i32_1 = arith.constant 0 : i32
    return %c0_i32, %c0_i32_0 : i32, i32
  }
  func.func @transform_3(%arg0: i32, %arg1: i32) -> (i32, i32) {
    %c0_i32 = arith.constant 0 : i32
    %c0_i32_0 = arith.constant 0 : i32
    %c0_i32_1 = arith.constant 0 : i32
    return %c0_i32, %c0_i32_0 : i32, i32
  }
  func.func @transform_4(%arg0: i32, %arg1: i32) -> (i32, i32) {
    %c0_i32 = arith.constant 0 : i32
    %c0_i32_0 = arith.constant 0 : i32
    %c0_i32_1 = arith.constant 0 : i32
    return %c0_i32, %c0_i32_0 : i32, i32
  }
  func.func @transform_5(%arg0: i32, %arg1: i32) -> (i32, i32) {
    %c0_i32 = arith.constant 0 : i32
    %c0_i32_0 = arith.constant 0 : i32
    %c0_i32_1 = arith.constant 0 : i32
    return %c0_i32, %c0_i32_0 : i32, i32
  }
  func.func @transform_6(%arg0: i32, %arg1: i32) -> (i32, i32) {
    %c0_i32 = arith.constant 0 : i32
    %c0_i32_0 = arith.constant 0 : i32
    %c0_i32_1 = arith.constant 0 : i32
    return %c0_i32, %c0_i32_0 : i32, i32
  }
  func.func @transform_7(%arg0: i32, %arg1: i32) -> (i32, i32) {
    %c0_i32 = arith.constant 0 : i32
    %c0_i32_0 = arith.constant 0 : i32
    %c0_i32_1 = arith.constant 0 : i32
    return %c0_i32, %c0_i32_0 : i32, i32
  }
  func.func @transform_8(%arg0: i32, %arg1: i32) -> (i32, i32) {
    %c0_i32 = arith.constant 0 : i32
    %c0_i32_0 = arith.constant 0 : i32
    %c0_i32_1 = arith.constant 0 : i32
    return %c0_i32, %c0_i32_0 : i32, i32
  }
  func.func @transform_9(%arg0: i32, %arg1: i32) -> (i32, i32) {
    %c0_i32 = arith.constant 0 : i32
    %c0_i32_0 = arith.constant 0 : i32
    %c0_i32_1 = arith.constant 0 : i32
    return %c0_i32, %c0_i32_0 : i32, i32
  }
  func.func @transform_10(%arg0: i32, %arg1: i32) -> (i32, i32) {
    %c0_i32 = arith.constant 0 : i32
    %c0_i32_0 = arith.constant 0 : i32
    %c0_i32_1 = arith.constant 0 : i32
    return %c0_i32, %c0_i32_0 : i32, i32
  }
  func.func @transform_11(%arg0: i32, %arg1: i32) -> (i32, i32) {
    %c0_i32 = arith.constant 0 : i32
    %c0_i32_0 = arith.constant 0 : i32
    return %arg0, %c0_i32 : i32, i32
  }
}

module attributes {stable_mosaic.version = 11 : i64} {
  func.func @policy_kernel(%arg0: i32, %arg1: i32, %arg2: memref<8x128xbf16, #tpu.memory_space<vmem>>, %arg3: memref<128x32xbf16, #tpu.memory_space<vmem>>, %arg4: memref<1x32xf32, #tpu.memory_space<vmem>>, %arg5: memref<1x32xf32, #tpu.memory_space<vmem>>, %arg6: memref<1x32xf32, #tpu.memory_space<vmem>>, %arg7: memref<32x32xbf16, #tpu.memory_space<vmem>>, %arg8: memref<1x32xf32, #tpu.memory_space<vmem>>, %arg9: memref<32x32xbf16, #tpu.memory_space<vmem>>, %arg10: memref<1x32xf32, #tpu.memory_space<vmem>>, %arg11: memref<32x256xbf16, #tpu.memory_space<vmem>>, %arg12: memref<1x256xf32, #tpu.memory_space<vmem>>, %arg13: memref<8x256xf32, #tpu.memory_space<vmem>>, %arg14: memref<8x32xf32, #tpu.memory_space<vmem>>) attributes {dimension_semantics = [#tpu.dimension_semantics<parallel>, #tpu.dimension_semantics<arbitrary>], iteration_bounds = array<i64: 1, 1>, scalar_prefetch = 0 : i64, scratch_operands = 1 : i64, tpu.core_type = #tpu.core_type<tc>, window_params = [{transform_indices = @transform_0, window_bounds = array<i64: 8, 128>}, {transform_indices = @transform_1, window_bounds = array<i64: 128, 32>}, {pipeline_mode = #tpu.pipeline_mode<synchronous>, transform_indices = @transform_2, window_bounds = array<i64: 1, 32>}, {pipeline_mode = #tpu.pipeline_mode<synchronous>, transform_indices = @transform_3, window_bounds = array<i64: 1, 32>}, {pipeline_mode = #tpu.pipeline_mode<synchronous>, transform_indices = @transform_4, window_bounds = array<i64: 1, 32>}, {pipeline_mode = #tpu.pipeline_mode<synchronous>, transform_indices = @transform_5, window_bounds = array<i64: 32, 32>}, {pipeline_mode = #tpu.pipeline_mode<synchronous>, transform_indices = @transform_6, window_bounds = array<i64: 1, 32>}, {pipeline_mode = #tpu.pipeline_mode<synchronous>, transform_indices = @transform_7, window_bounds = array<i64: 32, 32>}, {pipeline_mode = #tpu.pipeline_mode<synchronous>, transform_indices = @transform_8, window_bounds = array<i64: 1, 32>}, {pipeline_mode = #tpu.pipeline_mode<synchronous>, transform_indices = @transform_9, window_bounds = array<i64: 32, 256>}, {pipeline_mode = #tpu.pipeline_mode<synchronous>, transform_indices = @transform_10, window_bounds = array<i64: 1, 256>}, {transform_indices = @transform_11, window_bounds = array<i64: 8, 256>}]} {
    %c0_i32 = arith.constant 0 : i32
    %0 = arith.cmpi eq, %arg1, %c0_i32 : i32
    %1 = arith.extui %0 : i1 to i32
    %c0_i32_0 = arith.constant 0 : i32
    %2 = arith.cmpi ne, %1, %c0_i32_0 : i32
    scf.if %2 {
      %cst_10 = arith.constant 0.000000e+00 : f32
      %12 = vector.broadcast %cst_10 : f32 to vector<8x32xf32>
      %c0_11 = arith.constant 0 : index
      %c0_12 = arith.constant 0 : index
      %13 = vector.load %arg14[%c0_11, %c0_12] : memref<8x32xf32, #tpu.memory_space<vmem>>, vector<8x32xf32>
      tpu.vector_store %arg14[%c0_11, %c0_12], %12 {strides = array<i32>} : memref<8x32xf32, #tpu.memory_space<vmem>>, vector<8x32xf32>,
    } else {
    }
    %c0 = arith.constant 0 : index
    %c0_1 = arith.constant 0 : index
    %3 = vector.load %arg14[%c0, %c0_1] : memref<8x32xf32, #tpu.memory_space<vmem>>, vector<8x32xf32>
    %c0_2 = arith.constant 0 : index
    %c0_3 = arith.constant 0 : index
    %4 = vector.load %arg2[%c0_2, %c0_3] : memref<8x128xbf16, #tpu.memory_space<vmem>>, vector<8x128xbf16>
    %c0_4 = arith.constant 0 : index
    %c0_5 = arith.constant 0 : index
    %5 = vector.load %arg3[%c0_4, %c0_5] : memref<128x32xbf16, #tpu.memory_space<vmem>>, vector<128x32xbf16>
    %cst = arith.constant dense<0.000000e+00> : vector<8x32xf32>
    %6 = tpu.matmul %4, %5, %cst {dimension_numbers = #tpu.dot_dimension_numbers<[1], [0], [0], [1], [0, 0, 1, 1], [], []>} : vector<8x128xbf16>, vector<128x32xbf16>, vector<8x32xf32> -> vector<8x32xf32>
    %7 = arith.addf %3, %6 : vector<8x32xf32>
    %c0_6 = arith.constant 0 : index
    %c0_7 = arith.constant 0 : index
    %8 = vector.load %arg14[%c0_6, %c0_7] : memref<8x32xf32, #tpu.memory_space<vmem>>, vector<8x32xf32>
    tpu.vector_store %arg14[%c0_6, %c0_7], %7 {strides = array<i32>} : memref<8x32xf32, #tpu.memory_space<vmem>>, vector<8x32xf32>,
    %c0_i32_8 = arith.constant 0 : i32
    %9 = arith.cmpi eq, %arg1, %c0_i32_8 : i32
    %10 = arith.extui %9 : i1 to i32
    %c0_i32_9 = arith.constant 0 : i32
    %11 = arith.cmpi ne, %10, %c0_i32_9 : i32
    scf.if %11 {
      %c0_10 = arith.constant 0 : index
      %c0_11 = arith.constant 0 : index
      %12 = vector.load %arg14[%c0_10, %c0_11] : memref<8x32xf32, #tpu.memory_space<vmem>>, vector<8x32xf32>
      %c0_12 = arith.constant 0 : index
      %c0_13 = arith.constant 0 : index
      %13 = vector.load %arg4[%c0_12, %c0_13] : memref<1x32xf32, #tpu.memory_space<vmem>>, vector<1x32xf32>
      %14 = vector.broadcast %13 : vector<1x32xf32> to vector<8x32xf32>
      %15 = arith.addf %12, %14 : vector<8x32xf32>
      %cst_14 = arith.constant dense<0.000000e+00> : vector<8xf32>
      %16 = vector.multi_reduction <add>, %15, %cst_14 [1] : vector<8x32xf32> to vector<8xf32>
      %17 = vector.shape_cast %16 : vector<8xf32> to vector<8x1xf32>
      %cst_15 = arith.constant 3.200000e+01 : f32
      %18 = vector.broadcast %cst_15 : f32 to vector<8x1xf32>
      %19 = arith.divf %17, %18 : vector<8x1xf32>
      %20 = vector.broadcast %19 : vector<8x1xf32> to vector<8x32xf32>
      %21 = arith.subf %15, %20 : vector<8x32xf32>
      %22 = arith.mulf %21, %21 : vector<8x32xf32>
      %cst_16 = arith.constant dense<0.000000e+00> : vector<8xf32>
      %23 = vector.multi_reduction <add>, %22, %cst_16 [1] : vector<8x32xf32> to vector<8xf32>
      %24 = vector.shape_cast %23 : vector<8xf32> to vector<8x1xf32>
      %cst_17 = arith.constant 3.200000e+01 : f32
      %25 = vector.broadcast %cst_17 : f32 to vector<8x1xf32>
      %26 = arith.divf %24, %25 : vector<8x1xf32>
      %27 = vector.broadcast %19 : vector<8x1xf32> to vector<8x32xf32>
      %28 = arith.subf %15, %27 : vector<8x32xf32>
      %cst_18 = arith.constant 9.99999974E-6 : f32
      %29 = vector.broadcast %cst_18 : f32 to vector<8x1xf32>
      %30 = arith.addf %26, %29 : vector<8x1xf32>
      %31 = math.rsqrt %30 : vector<8x1xf32>
      %32 = vector.broadcast %31 : vector<8x1xf32> to vector<8x32xf32>
      %33 = arith.mulf %28, %32 : vector<8x32xf32>
      %c0_19 = arith.constant 0 : index
      %c0_20 = arith.constant 0 : index
      %34 = vector.load %arg5[%c0_19, %c0_20] : memref<1x32xf32, #tpu.memory_space<vmem>>, vector<1x32xf32>
      %35 = vector.broadcast %34 : vector<1x32xf32> to vector<8x32xf32>
      %36 = arith.mulf %33, %35 : vector<8x32xf32>
      %c0_21 = arith.constant 0 : index
      %c0_22 = arith.constant 0 : index
      %37 = vector.load %arg6[%c0_21, %c0_22] : memref<1x32xf32, #tpu.memory_space<vmem>>, vector<1x32xf32>
      %38 = vector.broadcast %37 : vector<1x32xf32> to vector<8x32xf32>
      %39 = arith.addf %36, %38 : vector<8x32xf32>
      %40 = math.tanh %39 : vector<8x32xf32>
      %41 = arith.truncf %40 : vector<8x32xf32> to vector<8x32xbf16>
      %c0_23 = arith.constant 0 : index
      %c0_24 = arith.constant 0 : index
      %42 = vector.load %arg7[%c0_23, %c0_24] : memref<32x32xbf16, #tpu.memory_space<vmem>>, vector<32x32xbf16>
      %cst_25 = arith.constant dense<0.000000e+00> : vector<8x32xf32>
      %43 = tpu.matmul %41, %42, %cst_25 {dimension_numbers = #tpu.dot_dimension_numbers<[1], [0], [0], [1], [0, 0, 1, 1], [], []>} : vector<8x32xbf16>, vector<32x32xbf16>, vector<8x32xf32> -> vector<8x32xf32>
      %c0_26 = arith.constant 0 : index
      %c0_27 = arith.constant 0 : index
      %44 = vector.load %arg8[%c0_26, %c0_27] : memref<1x32xf32, #tpu.memory_space<vmem>>, vector<1x32xf32>
      %45 = vector.broadcast %44 : vector<1x32xf32> to vector<8x32xf32>
      %46 = arith.addf %43, %45 : vector<8x32xf32>
      %cst_28 = arith.constant 0.000000e+00 : f32
      %47 = vector.broadcast %cst_28 : f32 to vector<8x32xf32>
      %48 = arith.maximumf %46, %47 : vector<8x32xf32>
      %49 = arith.truncf %48 : vector<8x32xf32> to vector<8x32xbf16>
      %c0_29 = arith.constant 0 : index
      %c0_30 = arith.constant 0 : index
      %50 = vector.load %arg9[%c0_29, %c0_30] : memref<32x32xbf16, #tpu.memory_space<vmem>>, vector<32x32xbf16>
      %cst_31 = arith.constant dense<0.000000e+00> : vector<8x32xf32>
      %51 = tpu.matmul %49, %50, %cst_31 {dimension_numbers = #tpu.dot_dimension_numbers<[1], [0], [0], [1], [0, 0, 1, 1], [], []>} : vector<8x32xbf16>, vector<32x32xbf16>, vector<8x32xf32> -> vector<8x32xf32>
      %c0_32 = arith.constant 0 : index
      %c0_33 = arith.constant 0 : index
      %52 = vector.load %arg10[%c0_32, %c0_33] : memref<1x32xf32, #tpu.memory_space<vmem>>, vector<1x32xf32>
      %53 = vector.broadcast %52 : vector<1x32xf32> to vector<8x32xf32>
      %54 = arith.addf %51, %53 : vector<8x32xf32>
      %cst_34 = arith.constant 0.000000e+00 : f32
      %55 = vector.broadcast %cst_34 : f32 to vector<8x32xf32>
      %56 = arith.maximumf %54, %55 : vector<8x32xf32>
      %57 = arith.truncf %56 : vector<8x32xf32> to vector<8x32xbf16>
      %c0_35 = arith.constant 0 : index
      %c0_36 = arith.constant 0 : index
      %58 = vector.load %arg11[%c0_35, %c0_36] : memref<32x256xbf16, #tpu.memory_space<vmem>>, vector<32x256xbf16>
      %cst_37 = arith.constant dense<0.000000e+00> : vector<8x256xf32>
      %59 = tpu.matmul %57, %58, %cst_37 {dimension_numbers = #tpu.dot_dimension_numbers<[1], [0], [0], [1], [0, 0, 1, 1], [], []>} : vector<8x32xbf16>, vector<32x256xbf16>, vector<8x256xf32> -> vector<8x256xf32>
      %c0_38 = arith.constant 0 : index
      %c0_39 = arith.constant 0 : index
      %60 = vector.load %arg12[%c0_38, %c0_39] : memref<1x256xf32, #tpu.memory_space<vmem>>, vector<1x256xf32>
      %61 = vector.broadcast %60 : vector<1x256xf32> to vector<8x256xf32>
      %62 = arith.addf %59, %61 : vector<8x256xf32>
      %63 = vector.extract_strided_slice %62 {offsets = [0, 0], sizes = [8, 128], strides = [1, 1]} : vector<8x256xf32> to vector<8x128xf32>
      %64 = vector.extract_strided_slice %62 {offsets = [0, 128], sizes = [8, 128], strides = [1, 1]} : vector<8x256xf32> to vector<8x128xf32>
      %cst_40 = arith.constant -2.000000e+01 : f32
      %cst_41 = arith.constant 2.000000e+00 : f32
      %65 = vector.broadcast %cst_40 : f32 to vector<8x128xf32>
      %66 = arith.maximumf %65, %64 : vector<8x128xf32>
      %67 = vector.broadcast %cst_41 : f32 to vector<8x128xf32>
      %68 = arith.minimumf %67, %66 : vector<8x128xf32>
      %69 = math.exp %68 : vector<8x128xf32>
      %70 = tpu.concatenate %63, %69 in 1 : vector<8x128xf32>, vector<8x128xf32> -> vector<8x256xf32>
      %c0_42 = arith.constant 0 : index
      %c0_43 = arith.constant 0 : index
      %71 = vector.load %arg13[%c0_42, %c0_43] : memref<8x256xf32, #tpu.memory_space<vmem>>, vector<8x256xf32>
      tpu.vector_store %arg13[%c0_42, %c0_43], %70 {strides = array<i32>} : memref<8x256xf32, #tpu.memory_space<vmem>>, vector<8x256xf32>,
    } else {
    }
    return
  }
  func.func @transform_0(%arg0: i32, %arg1: i32) -> (i32, i32) {
    %c0_i32 = arith.constant 0 : i32
    return %arg0, %arg1 : i32, i32
  }
  func.func @transform_1(%arg0: i32, %arg1: i32) -> (i32, i32) {
    %c0_i32 = arith.constant 0 : i32
    %c0_i32_0 = arith.constant 0 : i32
    return %arg1, %c0_i32 : i32, i32
  }
  func.func @transform_2(%arg0: i32, %arg1: i32) -> (i32, i32) {
    %c0_i32 = arith.constant 0 : i32
    %c0_i32_0 = arith.constant 0 : i32
    %c0_i32_1 = arith.constant 0 : i32
    return %c0_i32, %c0_i32_0 : i32, i32
  }
  func.func @transform_3(%arg0: i32, %arg1: i32) -> (i32, i32) {
    %c0_i32 = arith.constant 0 : i32
    %c0_i32_0 = arith.constant 0 : i32
    %c0_i32_1 = arith.constant 0 : i32
    return %c0_i32, %c0_i32_0 : i32, i32
  }
  func.func @transform_4(%arg0: i32, %arg1: i32) -> (i32, i32) {
    %c0_i32 = arith.constant 0 : i32
    %c0_i32_0 = arith.constant 0 : i32
    %c0_i32_1 = arith.constant 0 : i32
    return %c0_i32, %c0_i32_0 : i32, i32
  }
  func.func @transform_5(%arg0: i32, %arg1: i32) -> (i32, i32) {
    %c0_i32 = arith.constant 0 : i32
    %c0_i32_0 = arith.constant 0 : i32
    %c0_i32_1 = arith.constant 0 : i32
    return %c0_i32, %c0_i32_0 : i32, i32
  }
  func.func @transform_6(%arg0: i32, %arg1: i32) -> (i32, i32) {
    %c0_i32 = arith.constant 0 : i32
    %c0_i32_0 = arith.constant 0 : i32
    %c0_i32_1 = arith.constant 0 : i32
    return %c0_i32, %c0_i32_0 : i32, i32
  }
  func.func @transform_7(%arg0: i32, %arg1: i32) -> (i32, i32) {
    %c0_i32 = arith.constant 0 : i32
    %c0_i32_0 = arith.constant 0 : i32
    %c0_i32_1 = arith.constant 0 : i32
    return %c0_i32, %c0_i32_0 : i32, i32
  }
  func.func @transform_8(%arg0: i32, %arg1: i32) -> (i32, i32) {
    %c0_i32 = arith.constant 0 : i32
    %c0_i32_0 = arith.constant 0 : i32
    %c0_i32_1 = arith.constant 0 : i32
    return %c0_i32, %c0_i32_0 : i32, i32
  }
  func.func @transform_9(%arg0: i32, %arg1: i32) -> (i32, i32) {
    %c0_i32 = arith.constant 0 : i32
    %c0_i32_0 = arith.constant 0 : i32
    %c0_i32_1 = arith.constant 0 : i32
    return %c0_i32, %c0_i32_0 : i32, i32
  }
  func.func @transform_10(%arg0: i32, %arg1: i32) -> (i32, i32) {
    %c0_i32 = arith.constant 0 : i32
    %c0_i32_0 = arith.constant 0 : i32
    %c0_i32_1 = arith.constant 0 : i32
    return %c0_i32, %c0_i32_0 : i32, i32
  }
  func.func @transform_11(%arg0: i32, %arg1: i32) -> (i32, i32) {
    %c0_i32 = arith.constant 0 : i32
    %c0_i32_0 = arith.constant 0 : i32
    return %arg0, %c0_i32 : i32, i32
  }
}

</mosaic_0001>

<bundles_post_ra>
// kernel: tpu_custom_call.1
= control target key start
LH: loop header
LB: loop body
LE: loop exit
PB: predicated region body
PF: predicated region fallthrough
CT: control target
= control target key end

     0   :  { %vm44_vm0 = vcmask 261120   ;;  %v461_v2 = vmov 0.0   ;;  %s616_s0 = inlined_call_operand.vmem [shape: bf16[8,128], index: 0, kind: input, shape index: {}]   ;;  %s617_s1 = inlined_call_operand.vmem [shape: bf16[128,32], index: 1, kind: input, shape index: {}]   ;;  %s618_s2 = inlined_call_operand.vmem [shape: f32[1,32], index: 2, kind: input, shape index: {}]   ;;  %s619_s3 = inlined_call_operand.vmem [shape: f32[1,32], index: 3, kind: input, shape index: {}]   ;;  %s620_s4 = inlined_call_operand.vmem [shape: f32[1,32], index: 4, kind: input, shape index: {}]   ;;  %s621_s5 = inlined_call_operand.vmem [shape: bf16[32,32], index: 5, kind: input, shape index: {}]   ;;  %s622_s6 = inlined_call_operand.vmem [shape: f32[1,32], index: 6, kind: input, shape index: {}]   ;;  %s623_s7 = inlined_call_operand.vmem [shape: bf16[32,32], index: 7, kind: input, shape index: {}]   ;;  %s624_s8 = inlined_call_operand.vmem [shape: f32[1,32], index: 8, kind: input, shape index: {}]   ;;  %s625_s9 = inlined_call_operand.vmem [shape: bf16[32,256], index: 9, kind: input, shape index: {}]   ;;  %s626_s10 = inlined_call_operand.vmem [shape: f32[1,256], index: 10, kind: input, shape index: {}]   ;;  %s627_s11 = inlined_call_operand.hbm [shape: f32[8,256], index: 11, kind: output, shape index: {}]  }
   0x1   :  { %v410_v0 = vld [vmem:[%s617_s1 + $0x38] sm:$0xff]  ;;  %v409_v1 = vld [vmem:[%s617_s1 + $0x30] sm:$0xff]  ;;  %45 = vst.msk [vmem:[#allocation2] sm:$0xff] %vm44_vm0, %v461_v2 }
   0x2   :  { %112 = vmatpush.bf16.msra.mxu0 %v410_v0 }
   0x3   :  { %16 = vsyncpa [#allocation4], 0  ;;  %v408_v3 = vld [vmem:[%s617_s1 + $0x28] sm:$0xff]  ;;  %v407_v4 = vld [vmem:[%s617_s1 + $0x20] sm:$0xff]  ;;  %v462_v18 = vmov 32.0   ;;  %s326_s23 = sshll.u32 %s627_s11, 4  ;;  %s327_s23 = int_to_ptr.hbm [resolvable:$true] %s326_s23 }
   0x4   :  { %v406_v5 = vld [vmem:[%s617_s1 + $0x18] sm:$0xff]  ;;  %v405_v6 = vld [vmem:[%s617_s1 + $0x10] sm:$0xff]  ;;  %v404_v7 = vld [vmem:[%s617_s1 + $0x8] sm:$0xff]  ;;  %427 = vrcp.f32 %v462_v18 }
   0x5   :  { %v403_v8 = vld [vmem:[%s617_s1] sm:$0xff]  ;;  %v412_v30 = vld [vmem:[%s621_s5 + $0x8] sm:$0xff]  ;;  %v417_v51 = vld [vmem:[%s625_s9 + $0x14] sm:$0xf] }
   0x6   :  { %113 = vmatpush.bf16.msra.mxu0 %v409_v1  ;;  %v47_v9 = vld [vmem:[%s616_s0] sm:$0xf]  ;;  %207 = vmatpush.bf16.msra.mxu1 %v412_v30  ;;  %v414_v49 = vld [vmem:[%s623_s7 + $0x8] sm:$0xff]  ;;  %v397_v52 = vld [vmem:[%s625_s9 + $0x18] sm:$0xf0] }
   0x7   :  { %v422_v13 = vld [vmem:[%s618_s2] ss:$0 sm:$0xff]  ;;  %245 = vmatpush.bf16.msra.mxu2 %v414_v49  ;;  %v415_v53 = vld [vmem:[%s625_s9 + $0x4] sm:$0xf]  ;;  %v400_v54 = vor.u32 %v417_v51, %v397_v52  ;;  %v389_v55 = vld [vmem:[%s625_s9 + $0x8] sm:$0xf0] }
   0x8   :  { %v46_v10 = vld [vmem:[#allocation2] sm:$0xff]  ;;  %v392_v56 = vor.u32 %v415_v53, %v389_v55  ;;  %v395_v63 = vld [vmem:[%s625_s9 + $0x10] sm:$0xf]  ;;  %v418_v0 = vld [vmem:[%s625_s9 + $0x14] sm:$0xf0] }
   0x9   :  { %v411_v31 = vld [vmem:[%s621_s5] sm:$0xff]  ;;  %v396_v1 = vor.u32 %v418_v0, %v395_v63 }
   0xa   :  { %114 = vmatpush.bf16.msra.mxu0 %v408_v3  ;;  %v428_v19 = vpop.eup %427  ;;  %208 = vmatpush.bf16.msra.mxu1 %v411_v31  ;;  %v423_v41 = vld [vmem:[%s619_s3] ss:$0 sm:$0xff]  ;;  %v416_v3 = vld [vmem:[%s625_s9 + $0x4] sm:$0xf0] }
   0xb   :  { %v141_v20 = vmul.f32 32.0, %v428_v19  ;;  %vm145_vm1 = vweird.f32 %v428_v19  ;;  %v424_v44 = vld [vmem:[%s620_s4] ss:$0 sm:$0xff]  ;;  %293 = vmatpush.bf16.msra.mxu3 %v396_v1 }
   0xc   :  { %v413_v50 = vld [vmem:[%s623_s7] sm:$0xff] }
   0xd   :  { %v142_v21 = vsub.f32 1.0, %v141_v20  ;;  %246 = vmatpush.bf16.msra.mxu2 %v413_v50  ;;  %v425_v57 = vld [vmem:[%s622_s6] ss:$0 sm:$0xff] }
   0xe   :  { %115 = vmatpush.bf16.msra.mxu0 %v407_v4  ;;  %306 = vmatpush.bf16.msrb.mxu1 %v400_v54  ;;  %v387_v2 = vld [vmem:[%s625_s9] sm:$0xf] }
   0xf   :  { %v143_v22 = vmul.f32 %v428_v19, %v142_v21  ;;  %v388_v4 = vor.u32 %v416_v3, %v387_v2 }
  0x11   :  { %v144_v23 = vadd.f32 %v428_v19, %v143_v22  ;;  %294 = vmatpush.bf16.msra.mxu3 %v388_v4 }
  0x12   :  { %116 = vmatpush.bf16.msra.mxu0 %v406_v5  ;;  %307 = vmatpush.bf16.msrb.mxu1 %v392_v56  ;;  %v426_v5 = vld [vmem:[%s624_s8] ss:$0 sm:$0xff]  ;;  %s463_s8 = smov [#allocation3]  }
  0x13   :  { %v146_v24 = vsel %vm145_vm1, %v428_v19, %v144_v23  ;;  %s324_s9 = sshll.u32 %s463_s8, 4  ;;  %s325_s9 = int_to_ptr.vmem [resolvable:$true] %s324_s9 }
  0x16   :  { %117 = vmatpush.bf16.msra.mxu0 %v405_v6 }
  0x1a   :  { %118 = vmatpush.bf16.msra.mxu0 %v404_v7 }
  0x1e   :  { %119 = vmatpush.bf16.msra.mxu0 %v403_v8 }
  0x21   :  { %120 = vmatmul.bf16.vlgmr.msra.gmra.mxu0 %v47_v9 }
  0x9e   :  { %v121_v11 = vpop.f32.mrf.mxu0 }
  0x9f   :  { %v125_v12 = vadd.f32 %v121_v11, %v46_v10  ;;  %v258_v11 = vld [vmem:[%s626_s10] sm:$0x3] }
  0xa1   :  { %127 = vst.msk [vmem:[#allocation2] sm:$0xff] %vm44_vm0, %v125_v12  ;;  %v261_v12 = vperm.slane %v258_v11, 1 }
  0xa6   :  { %v123_v14 = vpop.f32.mrf.mxu0 }
  0xa8   :  { %v131_v15 = vld [vmem:[#allocation2] sm:$0xff] }
  0xa9   :  { %v136_v16 = vadd.f32 %v422_v13, %v131_v15 }
  0xab   :  { %v137_v17 = vsel %vm44_vm0, %v136_v16, 0.0 }
  0xac   :  { %138 = vadd.xlane.f32.xlu0 %v137_v17 }
 0x11f   :  { %v139_v25 = vpop.xlane.xlu0 %138 }
 0x120   :  { %v147_v26 = vmul.f32 %v146_v24, %v139_v25 }
 0x122   :  { %v148_v27 = vsub.f32 %v136_v16, %v147_v26  ;;  %v260_v16 = vperm.slane %v258_v11, 0 }
 0x124   :  { %v149_v28 = vmul.f32 %v148_v27, %v148_v27 }
 0x126   :  { %v150_v29 = vsel %vm44_vm0, %v149_v28, 0.0 }
 0x127   :  { %151 = vadd.xlane.f32.xlu0 %v150_v29 }
 0x19a   :  { %v152_v32 = vpop.xlane.xlu0 %151 }
 0x19b   :  { %v153_v33 = vmul.f32 %v152_v32, %v146_v24 }
 0x19d   :  { %v154_v34 = vadd.f32 1e-05, %v153_v33 }
 0x19f   :  { %429 = vrsqrt.f32 %v154_v34  ;;  %vm161_vm3 = vweird.f32 %v154_v34 }
 0x1a5   :  { %v430_v35 = vpop.eup %429 }
 0x1a6   :  { %v156_v36 = vmul.f32 %v430_v35, %v154_v34  ;;  %vm162_vm2 = vweird.f32 %v430_v35 }
 0x1a7   :  { %vm163_vm4 = vmor %vm161_vm3, %vm162_vm2 }
 0x1a8   :  { %v157_v37 = vmul.f32 %v430_v35, %v156_v36 }
 0x1aa   :  { %v158_v38 = vmul.f32 0.5, %v157_v37 }
 0x1ac   :  { %v159_v39 = vsub.f32 1.5, %v158_v38 }
 0x1ae   :  { %v160_v40 = vmul.f32 %v430_v35, %v159_v39 }
 0x1b0   :  { %v164_v42 = vsel %vm163_vm4, %v430_v35, %v160_v40 }
 0x1b1   :  { %v165_v43 = vmul.f32 %v164_v42, %v148_v27 }
 0x1b3   :  { %v170_v45 = vmul.f32 %v423_v41, %v165_v43 }
 0x1b5   :  { %v175_v46 = vadd.f32 %v424_v44, %v170_v45 }
 0x1b7   :  { %431 = vtanh.f32 %v175_v46 }
 0x1bd   :  { %v432_v47 = vpop.eup %431 }
 0x1be   :  { %v177_v48 = vpack.c.bf16 %v432_v47, %v432_v47 }
 0x1c0   :  { %375 = vmatmul.msk.bf16.vlgmr.msra.gmra.mxu1 %vm44_vm0, %v177_v48 }
 0x23d   :  { %v210_v58 = vpop.f32.mrf.mxu1 }
 0x23e   :  { %v211_v59 = vadd.f32 %v425_v57, %v210_v58 }
 0x240   :  { %v214_v60 = vmax.f32 %v211_v59, 0.0 }
 0x242   :  { %v215_v61 = vpack.c.bf16 %v214_v60, %v214_v60 }
 0x244   :  { %384 = vmatmul.msk.bf16.vlgmr.msra.gmra.mxu2 %vm44_vm0, %v215_v61 }
 0x245   :  { %v212_v62 = vpop.f32.mrf.mxu1 }
 0x2c7   :  { %v248_v6 = vpop.f32.mrf.mxu2 }
 0x2c8   :  { %v249_v7 = vadd.f32 %v426_v5, %v248_v6 }
 0x2ca   :  { %v252_v8 = vmax.f32 %v249_v7, 0.0 }
 0x2cc   :  { %v253_v9 = vpack.c.bf16 %v252_v8, %v252_v8 }
 0x2ce   :  { %401 = vmatmul.msk.bf16.vlgmr.msra.gmra.mxu3 %vm44_vm0, %v253_v9  ;;  %402 = vmatmul.msk.bf16.vlgmr.msrb.gmra.mxu1 %vm44_vm0, %v253_v9 }
 0x2cf   :  { %v250_v10 = vpop.f32.mrf.mxu2 }
 0x34b   :  { %v309_v13 = vpop.f32.mrf.mxu1 }
 0x34c   :  { %v310_v14 = vadd.f32 %v309_v13, %v261_v12 }
 0x34e   :  { %v313_v15 = vmax.f32 %v310_v14, -20.0 }
 0x350   :  { %v314_v17 = vmin.f32 %v313_v15, 2.0 }
 0x351   :  { %v296_v18 = vpop.f32.mrf.mxu3 }
 0x352   :  { %v315_v19 = vmul.f32 1.442695, %v314_v17  ;;  %v297_v20 = vadd.f32 %v296_v18, %v260_v16 }
 0x353   :  { %v311_v21 = vpop.f32.mrf.mxu1 }
 0x354   :  { %433 = vpow2.f32 %v315_v19  ;;  %317 = vst [vmem:[#allocation3] sm:$0xff] %v297_v20 }
 0x359   :  { %v298_v22 = vpop.f32.mrf.mxu3 }
 0x35a   :  { %v434_v23 = vpop.eup %433 }
 0x35b   :  { %318 = vst [vmem:[#allocation3 + $0x8] sm:$0xff] %v434_v23 }
 0x35c   :  { %329 = dma.vmem_to_hbm [thread:$0]  %s325_s9, 256, %s327_s23, [#allocation4]  }
 0x35d   :  { %459 = dma.done.wait [#allocation4], 256  }
 0x35e   :  { %460 = vsyncadd [#allocation4], 4294967040 }
 0x35f   :  { %334 = vsyncpa [#allocation4], 1 }

// kernel: tpu_custom_call.1
= control target key start
LH: loop header
LB: loop body
LE: loop exit
PB: predicated region body
PF: predicated region fallthrough
CT: control target
= control target key end

     0   :  { %vm44_vm0 = vcmask 261120   ;;  %v461_v2 = vmov 0.0   ;;  %s616_s0 = inlined_call_operand.vmem [shape: bf16[8,128], index: 0, kind: input, shape index: {}]   ;;  %s617_s1 = inlined_call_operand.vmem [shape: bf16[128,32], index: 1, kind: input, shape index: {}]   ;;  %s618_s2 = inlined_call_operand.vmem [shape: f32[1,32], index: 2, kind: input, shape index: {}]   ;;  %s619_s3 = inlined_call_operand.vmem [shape: f32[1,32], index: 3, kind: input, shape index: {}]   ;;  %s620_s4 = inlined_call_operand.vmem [shape: f32[1,32], index: 4, kind: input, shape index: {}]   ;;  %s621_s5 = inlined_call_operand.vmem [shape: bf16[32,32], index: 5, kind: input, shape index: {}]   ;;  %s622_s6 = inlined_call_operand.vmem [shape: f32[1,32], index: 6, kind: input, shape index: {}]   ;;  %s623_s7 = inlined_call_operand.vmem [shape: bf16[32,32], index: 7, kind: input, shape index: {}]   ;;  %s624_s8 = inlined_call_operand.vmem [shape: f32[1,32], index: 8, kind: input, shape index: {}]   ;;  %s625_s9 = inlined_call_operand.vmem [shape: bf16[32,256], index: 9, kind: input, shape index: {}]   ;;  %s626_s10 = inlined_call_operand.vmem [shape: f32[1,256], index: 10, kind: input, shape index: {}]   ;;  %s627_s11 = inlined_call_operand.hbm [shape: f32[8,256], index: 11, kind: output, shape index: {}]  }
   0x1   :  { %v410_v0 = vld [vmem:[%s617_s1 + $0x38] sm:$0xff]  ;;  %v409_v1 = vld [vmem:[%s617_s1 + $0x30] sm:$0xff]  ;;  %45 = vst.msk [vmem:[#allocation2] sm:$0xff] %vm44_vm0, %v461_v2 }
   0x2   :  { %112 = vmatpush.bf16.msra.mxu0 %v410_v0 }
   0x3   :  { %16 = vsyncpa [#allocation4], 0  ;;  %v408_v3 = vld [vmem:[%s617_s1 + $0x28] sm:$0xff]  ;;  %v407_v4 = vld [vmem:[%s617_s1 + $0x20] sm:$0xff]  ;;  %v462_v18 = vmov 32.0   ;;  %s326_s23 = sshll.u32 %s627_s11, 4  ;;  %s327_s23 = int_to_ptr.hbm [resolvable:$true] %s326_s23 }
   0x4   :  { %v406_v5 = vld [vmem:[%s617_s1 + $0x18] sm:$0xff]  ;;  %v405_v6 = vld [vmem:[%s617_s1 + $0x10] sm:$0xff]  ;;  %v404_v7 = vld [vmem:[%s617_s1 + $0x8] sm:$0xff]  ;;  %427 = vrcp.f32 %v462_v18 }
   0x5   :  { %v403_v8 = vld [vmem:[%s617_s1] sm:$0xff]  ;;  %v412_v30 = vld [vmem:[%s621_s5 + $0x8] sm:$0xff]  ;;  %v417_v51 = vld [vmem:[%s625_s9 + $0x14] sm:$0xf] }
   0x6   :  { %113 = vmatpush.bf16.msra.mxu0 %v409_v1  ;;  %v47_v9 = vld [vmem:[%s616_s0] sm:$0xf]  ;;  %207 = vmatpush.bf16.msra.mxu1 %v412_v30  ;;  %v414_v49 = vld [vmem:[%s623_s7 + $0x8] sm:$0xff]  ;;  %v397_v52 = vld [vmem:[%s625_s9 + $0x18] sm:$0xf0] }
   0x7   :  { %v422_v13 = vld [vmem:[%s618_s2] ss:$0 sm:$0xff]  ;;  %245 = vmatpush.bf16.msra.mxu2 %v414_v49  ;;  %v415_v53 = vld [vmem:[%s625_s9 + $0x4] sm:$0xf]  ;;  %v400_v54 = vor.u32 %v417_v51, %v397_v52  ;;  %v389_v55 = vld [vmem:[%s625_s9 + $0x8] sm:$0xf0] }
   0x8   :  { %v46_v10 = vld [vmem:[#allocation2] sm:$0xff]  ;;  %v392_v56 = vor.u32 %v415_v53, %v389_v55  ;;  %v395_v63 = vld [vmem:[%s625_s9 + $0x10] sm:$0xf]  ;;  %v418_v0 = vld [vmem:[%s625_s9 + $0x14] sm:$0xf0] }
   0x9   :  { %v411_v31 = vld [vmem:[%s621_s5] sm:$0xff]  ;;  %v396_v1 = vor.u32 %v418_v0, %v395_v63 }
   0xa   :  { %114 = vmatpush.bf16.msra.mxu0 %v408_v3  ;;  %v428_v19 = vpop.eup %427  ;;  %208 = vmatpush.bf16.msra.mxu1 %v411_v31  ;;  %v423_v41 = vld [vmem:[%s619_s3] ss:$0 sm:$0xff]  ;;  %v416_v3 = vld [vmem:[%s625_s9 + $0x4] sm:$0xf0] }
   0xb   :  { %v141_v20 = vmul.f32 32.0, %v428_v19  ;;  %vm145_vm1 = vweird.f32 %v428_v19  ;;  %v424_v44 = vld [vmem:[%s620_s4] ss:$0 sm:$0xff]  ;;  %293 = vmatpush.bf16.msra.mxu3 %v396_v1 }
   0xc   :  { %v413_v50 = vld [vmem:[%s623_s7] sm:$0xff] }
   0xd   :  { %v142_v21 = vsub.f32 1.0, %v141_v20  ;;  %246 = vmatpush.bf16.msra.mxu2 %v413_v50  ;;  %v425_v57 = vld [vmem:[%s622_s6] ss:$0 sm:$0xff] }
   0xe   :  { %115 = vmatpush.bf16.msra.mxu0 %v407_v4  ;;  %306 = vmatpush.bf16.msrb.mxu1 %v400_v54  ;;  %v387_v2 = vld [vmem:[%s625_s9] sm:$0xf] }
   0xf   :  { %v143_v22 = vmul.f32 %v428_v19, %v142_v21  ;;  %v388_v4 = vor.u32 %v416_v3, %v387_v2 }
  0x11   :  { %v144_v23 = vadd.f32 %v428_v19, %v143_v22  ;;  %294 = vmatpush.bf16.msra.mxu3 %v388_v4 }
  0x12   :  { %116 = vmatpush.bf16.msra.mxu0 %v406_v5  ;;  %307 = vmatpush.bf16.msrb.mxu1 %v392_v56  ;;  %v426_v5 = vld [vmem:[%s624_s8] ss:$0 sm:$0xff]  ;;  %s463_s8 = smov [#allocation3]  }
  0x13   :  { %v146_v24 = vsel %vm145_vm1, %v428_v19, %v144_v23  ;;  %s324_s9 = sshll.u32 %s463_s8, 4  ;;  %s325_s9 = int_to_ptr.vmem [resolvable:$true] %s324_s9 }
  0x16   :  { %117 = vmatpush.bf16.msra.mxu0 %v405_v6 }
  0x1a   :  { %118 = vmatpush.bf16.msra.mxu0 %v404_v7 }
  0x1e   :  { %119 = vmatpush.bf16.msra.mxu0 %v403_v8 }
  0x21   :  { %120 = vmatmul.bf16.vlgmr.msra.gmra.mxu0 %v47_v9 }
  0x9e   :  { %v121_v11 = vpop.f32.mrf.mxu0 }
  0x9f   :  { %v125_v12 = vadd.f32 %v121_v11, %v46_v10  ;;  %v258_v11 = vld [vmem:[%s626_s10] sm:$0x3] }
  0xa1   :  { %127 = vst.msk [vmem:[#allocation2] sm:$0xff] %vm44_vm0, %v125_v12  ;;  %v261_v12 = vperm.slane %v258_v11, 1 }
  0xa6   :  { %v123_v14 = vpop.f32.mrf.mxu0 }
  0xa8   :  { %v131_v15 = vld [vmem:[#allocation2] sm:$0xff] }
  0xa9   :  { %v136_v16 = vadd.f32 %v422_v13, %v131_v15 }
  0xab   :  { %v137_v17 = vsel %vm44_vm0, %v136_v16, 0.0 }
  0xac   :  { %138 = vadd.xlane.f32.xlu0 %v137_v17 }
 0x11f   :  { %v139_v25 = vpop.xlane.xlu0 %138 }
 0x120   :  { %v147_v26 = vmul.f32 %v146_v24, %v139_v25 }
 0x122   :  { %v148_v27 = vsub.f32 %v136_v16, %v147_v26  ;;  %v260_v16 = vperm.slane %v258_v11, 0 }
 0x124   :  { %v149_v28 = vmul.f32 %v148_v27, %v148_v27 }
 0x126   :  { %v150_v29 = vsel %vm44_vm0, %v149_v28, 0.0 }
 0x127   :  { %151 = vadd.xlane.f32.xlu0 %v150_v29 }
 0x19a   :  { %v152_v32 = vpop.xlane.xlu0 %151 }
 0x19b   :  { %v153_v33 = vmul.f32 %v152_v32, %v146_v24 }
 0x19d   :  { %v154_v34 = vadd.f32 1e-05, %v153_v33 }
 0x19f   :  { %429 = vrsqrt.f32 %v154_v34  ;;  %vm161_vm3 = vweird.f32 %v154_v34 }
 0x1a5   :  { %v430_v35 = vpop.eup %429 }
 0x1a6   :  { %v156_v36 = vmul.f32 %v430_v35, %v154_v34  ;;  %vm162_vm2 = vweird.f32 %v430_v35 }
 0x1a7   :  { %vm163_vm4 = vmor %vm161_vm3, %vm162_vm2 }
 0x1a8   :  { %v157_v37 = vmul.f32 %v430_v35, %v156_v36 }
 0x1aa   :  { %v158_v38 = vmul.f32 0.5, %v157_v37 }
 0x1ac   :  { %v159_v39 = vsub.f32 1.5, %v158_v38 }
 0x1ae   :  { %v160_v40 = vmul.f32 %v430_v35, %v159_v39 }
 0x1b0   :  { %v164_v42 = vsel %vm163_vm4, %v430_v35, %v160_v40 }
 0x1b1   :  { %v165_v43 = vmul.f32 %v164_v42, %v148_v27 }
 0x1b3   :  { %v170_v45 = vmul.f32 %v423_v41, %v165_v43 }
 0x1b5   :  { %v175_v46 = vadd.f32 %v424_v44, %v170_v45 }
 0x1b7   :  { %431 = vtanh.f32 %v175_v46 }
 0x1bd   :  { %v432_v47 = vpop.eup %431 }
 0x1be   :  { %v177_v48 = vpack.c.bf16 %v432_v47, %v432_v47 }
 0x1c0   :  { %375 = vmatmul.msk.bf16.vlgmr.msra.gmra.mxu1 %vm44_vm0, %v177_v48 }
 0x23d   :  { %v210_v58 = vpop.f32.mrf.mxu1 }
 0x23e   :  { %v211_v59 = vadd.f32 %v425_v57, %v210_v58 }
 0x240   :  { %v214_v60 = vmax.f32 %v211_v59, 0.0 }
 0x242   :  { %v215_v61 = vpack.c.bf16 %v214_v60, %v214_v60 }
 0x244   :  { %384 = vmatmul.msk.bf16.vlgmr.msra.gmra.mxu2 %vm44_vm0, %v215_v61 }
 0x245   :  { %v212_v62 = vpop.f32.mrf.mxu1 }
 0x2c7   :  { %v248_v6 = vpop.f32.mrf.mxu2 }
 0x2c8   :  { %v249_v7 = vadd.f32 %v426_v5, %v248_v6 }
 0x2ca   :  { %v252_v8 = vmax.f32 %v249_v7, 0.0 }
 0x2cc   :  { %v253_v9 = vpack.c.bf16 %v252_v8, %v252_v8 }
 0x2ce   :  { %401 = vmatmul.msk.bf16.vlgmr.msra.gmra.mxu3 %vm44_vm0, %v253_v9  ;;  %402 = vmatmul.msk.bf16.vlgmr.msrb.gmra.mxu1 %vm44_vm0, %v253_v9 }
 0x2cf   :  { %v250_v10 = vpop.f32.mrf.mxu2 }
 0x34b   :  { %v309_v13 = vpop.f32.mrf.mxu1 }
 0x34c   :  { %v310_v14 = vadd.f32 %v309_v13, %v261_v12 }
 0x34e   :  { %v313_v15 = vmax.f32 %v310_v14, -20.0 }
 0x350   :  { %v314_v17 = vmin.f32 %v313_v15, 2.0 }
 0x351   :  { %v296_v18 = vpop.f32.mrf.mxu3 }
 0x352   :  { %v315_v19 = vmul.f32 1.442695, %v314_v17  ;;  %v297_v20 = vadd.f32 %v296_v18, %v260_v16 }
 0x353   :  { %v311_v21 = vpop.f32.mrf.mxu1 }
 0x354   :  { %433 = vpow2.f32 %v315_v19  ;;  %317 = vst [vmem:[#allocation3] sm:$0xff] %v297_v20 }
 0x359   :  { %v298_v22 = vpop.f32.mrf.mxu3 }
 0x35a   :  { %v434_v23 = vpop.eup %433 }
 0x35b   :  { %318 = vst [vmem:[#allocation3 + $0x8] sm:$0xff] %v434_v23 }
 0x35c   :  { %329 = dma.vmem_to_hbm [thread:$0]  %s325_s9, 256, %s327_s23, [#allocation4]  }
 0x35d   :  { %459 = dma.done.wait [#allocation4], 256  }
 0x35e   :  { %460 = vsyncadd [#allocation4], 4294967040 }
 0x35f   :  { %334 = vsyncpa [#allocation4], 1 }

</bundles_post_ra>
